<compile_context>
chip_gen: v7x
topology: tpu7x:2x2x1
jax: 0.10.0
libtpu: 0.0.40
codegen_flags: <defaults>
</compile_context>

<pallas_src>
import math

import jax
import jax.numpy as jnp
from jax import lax
from jax.experimental import pallas as pl
from jax.experimental.pallas import tpu as pltpu


# ---------------------------------------------------------------------------
# Kernel: one batch tile, all channels fused into the lane dimension.
# ---------------------------------------------------------------------------
def _default_tail_kernel(x_ref, scale_ref, shift_ref,
                         w0_ref, b0_ref, w1_ref, b1_ref,
                         w2_ref, b2_ref, w3_ref, b3_ref,
                         out_ref):
    """Shapes (per batch tile of size Bt, channel dim folded into lanes):

      x     (Bt, F + C*P)          scale/shift (1, F + C*P)
      w0    (F + C*P, C*H0)        b0 (1, C*H0)
      w1    (C*H0, C*H1)           b1 (1, C*H1)
      w2    (C*H1, C*H2)           b2 (1, C*H2)
      w3    (C*H2, C)              b3 (1, C)
      out   (Bt, C)
    """
    # Fused normalization: identity on the f columns, (z - mean)*rsqrt(var+eps)
    # on the z columns (stats precomputed on the host over the FULL batch).
    x = x_ref[...] * scale_ref[...] + shift_ref[...]

    h = jnp.maximum(
        jnp.dot(x, w0_ref[...], preferred_element_type=jnp.float32) + b0_ref[...], 0.0)
    h = jnp.maximum(
        jnp.dot(h, w1_ref[...], preferred_element_type=jnp.float32) + b1_ref[...], 0.0)
    h = jnp.maximum(
        jnp.dot(h, w2_ref[...], preferred_element_type=jnp.float32) + b2_ref[...], 0.0)

    # Final layer: block-diagonal (C*H2, C) weight -> output already lane-dense
    # in its stored (Bt, C) orientation (Dropout p=0 == identity everywhere).
    out_ref[...] = (
        jnp.dot(h, w3_ref[...], preferred_element_type=jnp.float32) + b3_ref[...])


# ---------------------------------------------------------------------------
# Host-side helpers
# ---------------------------------------------------------------------------
def _combine(params, param_list):
    """Channel-major JAX port of swyft._combine for batched (B,) params -> (C, B, P)."""
    P = max(len(c) for c in param_list)
    rows = []
    for c in param_list:
        pars = jnp.stack([params[k] for k in c], axis=1).astype(jnp.float32)  # (B, len(c))
        if pars.shape[1] < P:
            pars = jnp.pad(pars, ((0, 0), (0, P - pars.shape[1])))
        rows.append(pars)
    return jnp.stack(rows, axis=0)                                            # (C, B, P)


def _block_diag(blocks):
    """Stack per-channel (din, dout) blocks into a (C*din, C*dout) block-diagonal."""
    C = len(blocks)
    din, dout = blocks[0].shape
    out = jnp.zeros((C * din, C * dout), blocks[0].dtype)
    for c, b in enumerate(blocks):
        out = out.at[c * din:(c + 1) * din, c * dout:(c + 1) * dout].set(b)
    return out


def init_linear_with_channel(key, in_size, out_size, channels):
    """Deterministic init matching LinearWithChannel.reset_parameters bounds.

    PyTorch weight tensor is (C, out, in); fan_in = out * in.
    kaiming_uniform_(a=sqrt(3)): bound = sqrt(3) * sqrt(2/(1+3)) / sqrt(fan_in).
    Returned in kernel-friendly layout: w -> (C, in, out), b -> (C, 1, out).
    """
    kw, kb = jax.random.split(key)
    fan_in = out_size * in_size
    gain = math.sqrt(2.0 / (1.0 + 3.0))
    w_bound = math.sqrt(3.0) * gain / math.sqrt(fan_in)
    b_bound = 1.0 / math.sqrt(fan_in)
    w = jax.random.uniform(kw, (channels, out_size, in_size), jnp.float32,
                           -w_bound, w_bound)
    b = jax.random.uniform(kb, (channels, out_size), jnp.float32,
                           -b_bound, b_bound)
    return jnp.transpose(w, (0, 2, 1)), b[:, None, :]


def _prepare_weights(weights, F, C):
    """Fold the channel dim into the lane dim: concat / block-diagonalize weights.

    Input layouts: w (C, in, out), b (C, 1, out); cat order in PyTorch is [f, z],
    so rows [:F] of W0 are the f-part and rows [F:] the z-part.
    """
    (w0, b0), (w1, b1), (w2, b2), (w3, b3) = weights
    H0 = w0.shape[2]

    w0f = w0[:, :F, :]                                            # (C, F, H0)
    w0z = w0[:, F:, :]                                            # (C, P, H0)
    # f columns feed every channel block -> horizontal concat: (F, C*H0)
    W0f_cat = jnp.transpose(w0f, (1, 0, 2)).reshape(F, C * H0)
    # z columns are per-channel -> block diagonal: (C*P, C*H0)
    W0z_bd = _block_diag([w0z[c] for c in range(C)])
    W0 = jnp.concatenate([W0f_cat, W0z_bd], axis=0)               # (F + C*P, C*H0)
    B0 = b0.reshape(1, -1)                                        # (1, C*H0)

    # NOTE: at these shapes C*H = 96 <= 128 fits one MXU pass on every
    # generation; for large C the block-diagonal should be chunked per 128
    # (v5e) / 256 (v6e, v7x) lanes instead of one huge weight.
    W1 = _block_diag([w1[c] for c in range(C)]);  B1 = b1.reshape(1, -1)
    W2 = _block_diag([w2[c] for c in range(C)]);  B2 = b2.reshape(1, -1)
    W3 = _block_diag([w3[c] for c in range(C)])                   # (C*H2, C)
    B3 = b3.reshape(1, C)
    return W0, B0, W1, B1, W2, B2, W3, B3


# ---------------------------------------------------------------------------
# Forward pass wrapper
# ---------------------------------------------------------------------------
def default_tail_forward(f, params, param_list, weights, eps=1e-10):
    """Forward pass of DefaultTail (tail_features=False, online_norm=True, p=0)."""
    B, F = f.shape
    C = len(param_list)
    P = max(len(c) for c in param_list)
    # OnlineNormalizationLayer's variance path needs n > 1 (PyTorch nab>1 branch).
    assert B > 1, "DefaultTail Pallas kernel requires batch size > 1"

    # --- combine params + GLOBAL batch normalization statistics (host, tiny) ---
    z_c = _combine(params, param_list)                            # (C, B, P)
    mean = jnp.mean(z_c, axis=1)                                  # (C, P)
    var_u = jnp.sum((z_c - mean[:, None, :]) ** 2, axis=1) / (B - 1.0)
    inv_std = lax.rsqrt(var_u + eps)                              # (C, P)
    # Zero-padded parameter columns (len(c) < P): mean=0, var=0 -> scale
    # rsqrt(eps), shift 0, z=0 -> normalized value stays exactly 0 (matches
    # the PyTorch module).

    # Fused normalization as a scale/shift over the concatenated [f | z] input:
    # identity on the F f-columns, (z - mean) * inv_std on the C*P z-columns.
    D_in = F + C * P
    scale = jnp.concatenate(
        [jnp.ones((F,), jnp.float32), inv_std.reshape(C * P)]).reshape(1, D_in)
    shift = jnp.concatenate(
        [jnp.zeros((F,), jnp.float32), (-mean * inv_std).reshape(C * P)]).reshape(1, D_in)

    z_flat = jnp.transpose(z_c, (1, 0, 2)).reshape(B, C * P)      # (B, C*P), channel-major
    x = jnp.concatenate([f.astype(jnp.float32), z_flat], axis=-1)  # (B, D_in)

    # --- batch tiling: sublane multiple of 8; cap tile at 512 rows and shard
    #     the batch over a "parallel" grid axis (megacore / 2-TC v7x).
    tile_b = 512 if B > 512 else max(8, ((B + 7) // 8) * 8)
    B_pad = ((B + tile_b - 1) // tile_b) * tile_b
    x = jnp.pad(x, ((0, B_pad - B), (0, 0)))                      # padded rows sliced off below

    # --- host weight prep: channel dim folded into the lane dim ---
    W0, B0, W1, B1, W2, B2, W3, B3 = _prepare_weights(weights, F, C)

    def resident(arr):      # weights / stats: constant index map -> VMEM-resident
        return pl.BlockSpec(arr.shape, lambda i: (0, 0))

    out_pad = pl.pallas_call(
        _default_tail_kernel,
        out_shape=jax.ShapeDtypeStruct((B_pad, C), jnp.float32),
        grid=(B_pad // tile_b,),
        in_specs=[pl.BlockSpec((tile_b, D_in), lambda i: (i, 0)),
                  resident(scale), resident(shift),
                  resident(W0), resident(B0),
                  resident(W1), resident(B1),
                  resident(W2), resident(B2),
                  resident(W3), resident(B3)],
        out_specs=pl.BlockSpec((tile_b, C), lambda i: (i, 0)),
        compiler_params=pltpu.CompilerParams(
            dimension_semantics=("parallel",)),
    )(x, scale, shift, W0, B0, W1, B1, W2, B2, W3, B3)

    return out_pad[:B, :]                                         # (B, C) == x.squeeze(-1)


if __name__ == "__main__":
    key = jax.random.PRNGKey(0)
    keys = jax.random.split(key, 8)

    # Small shapes consistent with the module.
    B = 2
    n_features = 16
    param_list = [["a", "b"], ["c"], ["b", "c"]]    # n_channels=3, pdim=2
    hidden_layers = [32, 32, 32]
    C = len(param_list)
    P = max(len(c) for c in param_list)

    f = jax.random.normal(keys[0], (B, n_features), jnp.float32)
    params = {
        "a": jax.random.normal(keys[1], (B,), jnp.float32),
        "b": jax.random.normal(keys[2], (B,), jnp.float32),
        "c": jax.random.normal(keys[3], (B,), jnp.float32),
    }

    # tail_features=False -> n_tail_features = n_features; estimator input = P + F.
    d_in = P + n_features
    weights = [
        init_linear_with_channel(keys[4], d_in, hidden_layers[0], C),
        init_linear_with_channel(keys[5], hidden_layers[0], hidden_layers[1], C),
        init_linear_with_channel(keys[6], hidden_layers[1], hidden_layers[2], C),
        init_linear_with_channel(keys[7], hidden_layers[2], 1, C),
    ]
    # TODO(synk): OnlineNormalizationLayer running buffers (n, _mean, _M2) are not
    # persisted across calls; the kernel reproduces the first training-mode call.

    lnL = default_tail_forward(f, params, param_list, weights)
    jax.block_until_ready(lnL)
    assert lnL.shape == (B, C) and lnL.dtype == jnp.float32
    assert bool(jnp.all(jnp.isfinite(lnL)))
    print("KERNEL_OK")
</pallas_src>

<mosaic_0001>
module attributes {stable_mosaic.version = 11 : i64} {
  func.func @_default_tail_kernel(%arg0: i32, %arg1: memref<8x22xf32, #tpu.memory_space<vmem>>, %arg2: memref<1x22xf32, #tpu.memory_space<vmem>>, %arg3: memref<1x22xf32, #tpu.memory_space<vmem>>, %arg4: memref<22x96xf32, #tpu.memory_space<vmem>>, %arg5: memref<1x96xf32, #tpu.memory_space<vmem>>, %arg6: memref<96x96xf32, #tpu.memory_space<vmem>>, %arg7: memref<1x96xf32, #tpu.memory_space<vmem>>, %arg8: memref<96x96xf32, #tpu.memory_space<vmem>>, %arg9: memref<1x96xf32, #tpu.memory_space<vmem>>, %arg10: memref<96x3xf32, #tpu.memory_space<vmem>>, %arg11: memref<1x3xf32, #tpu.memory_space<vmem>>, %arg12: memref<8x3xf32, #tpu.memory_space<vmem>>) attributes {dimension_semantics = [#tpu.dimension_semantics<parallel>], iteration_bounds = array<i64: 1>, scalar_prefetch = 0 : i64, scratch_operands = 0 : i64, tpu.core_type = #tpu.core_type<tc>, window_params = [{transform_indices = @transform_0, window_bounds = array<i64: 8, 22>}, {pipeline_mode = #tpu.pipeline_mode<synchronous>, transform_indices = @transform_1, window_bounds = array<i64: 1, 22>}, {pipeline_mode = #tpu.pipeline_mode<synchronous>, transform_indices = @transform_2, window_bounds = array<i64: 1, 22>}, {pipeline_mode = #tpu.pipeline_mode<synchronous>, transform_indices = @transform_3, window_bounds = array<i64: 22, 96>}, {pipeline_mode = #tpu.pipeline_mode<synchronous>, transform_indices = @transform_4, window_bounds = array<i64: 1, 96>}, {pipeline_mode = #tpu.pipeline_mode<synchronous>, transform_indices = @transform_5, window_bounds = array<i64: 96, 96>}, {pipeline_mode = #tpu.pipeline_mode<synchronous>, transform_indices = @transform_6, window_bounds = array<i64: 1, 96>}, {pipeline_mode = #tpu.pipeline_mode<synchronous>, transform_indices = @transform_7, window_bounds = array<i64: 96, 96>}, {pipeline_mode = #tpu.pipeline_mode<synchronous>, transform_indices = @transform_8, window_bounds = array<i64: 1, 96>}, {pipeline_mode = #tpu.pipeline_mode<synchronous>, transform_indices = @transform_9, window_bounds = array<i64: 96, 3>}, {pipeline_mode = #tpu.pipeline_mode<synchronous>, transform_indices = @transform_10, window_bounds = array<i64: 1, 3>}, {transform_indices = @transform_11, window_bounds = array<i64: 8, 3>}]} {
    %c0 = arith.constant 0 : index
    %c0_0 = arith.constant 0 : index
    %0 = vector.load %arg1[%c0, %c0_0] : memref<8x22xf32, #tpu.memory_space<vmem>>, vector<8x22xf32>
    %c0_1 = arith.constant 0 : index
    %c0_2 = arith.constant 0 : index
    %1 = vector.load %arg2[%c0_1, %c0_2] : memref<1x22xf32, #tpu.memory_space<vmem>>, vector<1x22xf32>
    %2 = vector.broadcast %1 : vector<1x22xf32> to vector<8x22xf32>
    %3 = arith.mulf %0, %2 : vector<8x22xf32>
    %c0_3 = arith.constant 0 : index
    %c0_4 = arith.constant 0 : index
    %4 = vector.load %arg3[%c0_3, %c0_4] : memref<1x22xf32, #tpu.memory_space<vmem>>, vector<1x22xf32>
    %5 = vector.broadcast %4 : vector<1x22xf32> to vector<8x22xf32>
    %6 = arith.addf %3, %5 : vector<8x22xf32>
    %c0_5 = arith.constant 0 : index
    %c0_6 = arith.constant 0 : index
    %7 = vector.load %arg4[%c0_5, %c0_6] : memref<22x96xf32, #tpu.memory_space<vmem>>, vector<22x96xf32>
    %cst = arith.constant dense<0.000000e+00> : vector<8x96xf32>
    %8 = tpu.matmul %6, %7, %cst {dimension_numbers = #tpu.dot_dimension_numbers<[1], [0], [0], [1], [0, 0, 1, 1], [], []>} : vector<8x22xf32>, vector<22x96xf32>, vector<8x96xf32> -> vector<8x96xf32>
    %c0_7 = arith.constant 0 : index
    %c0_8 = arith.constant 0 : index
    %9 = vector.load %arg5[%c0_7, %c0_8] : memref<1x96xf32, #tpu.memory_space<vmem>>, vector<1x96xf32>
    %10 = vector.broadcast %9 : vector<1x96xf32> to vector<8x96xf32>
    %11 = arith.addf %8, %10 : vector<8x96xf32>
    %cst_9 = arith.constant 0.000000e+00 : f32
    %12 = vector.broadcast %cst_9 : f32 to vector<8x96xf32>
    %13 = arith.maximumf %11, %12 : vector<8x96xf32>
    %c0_10 = arith.constant 0 : index
    %c0_11 = arith.constant 0 : index
    %14 = vector.load %arg6[%c0_10, %c0_11] : memref<96x96xf32, #tpu.memory_space<vmem>>, vector<96x96xf32>
    %cst_12 = arith.constant dense<0.000000e+00> : vector<8x96xf32>
    %15 = tpu.matmul %13, %14, %cst_12 {dimension_numbers = #tpu.dot_dimension_numbers<[1], [0], [0], [1], [0, 0, 1, 1], [], []>} : vector<8x96xf32>, vector<96x96xf32>, vector<8x96xf32> -> vector<8x96xf32>
    %c0_13 = arith.constant 0 : index
    %c0_14 = arith.constant 0 : index
    %16 = vector.load %arg7[%c0_13, %c0_14] : memref<1x96xf32, #tpu.memory_space<vmem>>, vector<1x96xf32>
    %17 = vector.broadcast %16 : vector<1x96xf32> to vector<8x96xf32>
    %18 = arith.addf %15, %17 : vector<8x96xf32>
    %cst_15 = arith.constant 0.000000e+00 : f32
    %19 = vector.broadcast %cst_15 : f32 to vector<8x96xf32>
    %20 = arith.maximumf %18, %19 : vector<8x96xf32>
    %c0_16 = arith.constant 0 : index
    %c0_17 = arith.constant 0 : index
    %21 = vector.load %arg8[%c0_16, %c0_17] : memref<96x96xf32, #tpu.memory_space<vmem>>, vector<96x96xf32>
    %cst_18 = arith.constant dense<0.000000e+00> : vector<8x96xf32>
    %22 = tpu.matmul %20, %21, %cst_18 {dimension_numbers = #tpu.dot_dimension_numbers<[1], [0], [0], [1], [0, 0, 1, 1], [], []>} : vector<8x96xf32>, vector<96x96xf32>, vector<8x96xf32> -> vector<8x96xf32>
    %c0_19 = arith.constant 0 : index
    %c0_20 = arith.constant 0 : index
    %23 = vector.load %arg9[%c0_19, %c0_20] : memref<1x96xf32, #tpu.memory_space<vmem>>, vector<1x96xf32>
    %24 = vector.broadcast %23 : vector<1x96xf32> to vector<8x96xf32>
    %25 = arith.addf %22, %24 : vector<8x96xf32>
    %cst_21 = arith.constant 0.000000e+00 : f32
    %26 = vector.broadcast %cst_21 : f32 to vector<8x96xf32>
    %27 = arith.maximumf %25, %26 : vector<8x96xf32>
    %c0_22 = arith.constant 0 : index
    %c0_23 = arith.constant 0 : index
    %28 = vector.load %arg10[%c0_22, %c0_23] : memref<96x3xf32, #tpu.memory_space<vmem>>, vector<96x3xf32>
    %cst_24 = arith.constant dense<0.000000e+00> : vector<8x3xf32>
    %29 = tpu.matmul %27, %28, %cst_24 {dimension_numbers = #tpu.dot_dimension_numbers<[1], [0], [0], [1], [0, 0, 1, 1], [], []>} : vector<8x96xf32>, vector<96x3xf32>, vector<8x3xf32> -> vector<8x3xf32>
    %c0_25 = arith.constant 0 : index
    %c0_26 = arith.constant 0 : index
    %30 = vector.load %arg11[%c0_25, %c0_26] : memref<1x3xf32, #tpu.memory_space<vmem>>, vector<1x3xf32>
    %31 = vector.broadcast %30 : vector<1x3xf32> to vector<8x3xf32>
    %32 = arith.addf %29, %31 : vector<8x3xf32>
    %c0_27 = arith.constant 0 : index
    %c0_28 = arith.constant 0 : index
    %33 = vector.load %arg12[%c0_27, %c0_28] : memref<8x3xf32, #tpu.memory_space<vmem>>, vector<8x3xf32>
    tpu.vector_store %arg12[%c0_27, %c0_28], %32 {strides = array<i32>} : memref<8x3xf32, #tpu.memory_space<vmem>>, vector<8x3xf32>,
    return
  }
  func.func @transform_0(%arg0: i32) -> (i32, i32) {
    %c0_i32 = arith.constant 0 : i32
    %c0_i32_0 = arith.constant 0 : i32
    return %arg0, %c0_i32 : i32, i32
  }
  func.func @transform_1(%arg0: i32) -> (i32, i32) {
    %c0_i32 = arith.constant 0 : i32
    %c0_i32_0 = arith.constant 0 : i32
    %c0_i32_1 = arith.constant 0 : i32
    return %c0_i32, %c0_i32_0 : i32, i32
  }
  func.func @transform_2(%arg0: i32) -> (i32, i32) {
    %c0_i32 = arith.constant 0 : i32
    %c0_i32_0 = arith.constant 0 : i32
    %c0_i32_1 = arith.constant 0 : i32
    return %c0_i32, %c0_i32_0 : i32, i32
  }
  func.func @transform_3(%arg0: i32) -> (i32, i32) {
    %c0_i32 = arith.constant 0 : i32
    %c0_i32_0 = arith.constant 0 : i32
    %c0_i32_1 = arith.constant 0 : i32
    return %c0_i32, %c0_i32_0 : i32, i32
  }
  func.func @transform_4(%arg0: i32) -> (i32, i32) {
    %c0_i32 = arith.constant 0 : i32
    %c0_i32_0 = arith.constant 0 : i32
    %c0_i32_1 = arith.constant 0 : i32
    return %c0_i32, %c0_i32_0 : i32, i32
  }
  func.func @transform_5(%arg0: i32) -> (i32, i32) {
    %c0_i32 = arith.constant 0 : i32
    %c0_i32_0 = arith.constant 0 : i32
    %c0_i32_1 = arith.constant 0 : i32
    return %c0_i32, %c0_i32_0 : i32, i32
  }
  func.func @transform_6(%arg0: i32) -> (i32, i32) {
    %c0_i32 = arith.constant 0 : i32
    %c0_i32_0 = arith.constant 0 : i32
    %c0_i32_1 = arith.constant 0 : i32
    return %c0_i32, %c0_i32_0 : i32, i32
  }
  func.func @transform_7(%arg0: i32) -> (i32, i32) {
    %c0_i32 = arith.constant 0 : i32
    %c0_i32_0 = arith.constant 0 : i32
    %c0_i32_1 = arith.constant 0 : i32
    return %c0_i32, %c0_i32_0 : i32, i32
  }
  func.func @transform_8(%arg0: i32) -> (i32, i32) {
    %c0_i32 = arith.constant 0 : i32
    %c0_i32_0 = arith.constant 0 : i32
    %c0_i32_1 = arith.constant 0 : i32
    return %c0_i32, %c0_i32_0 : i32, i32
  }
  func.func @transform_9(%arg0: i32) -> (i32, i32) {
    %c0_i32 = arith.constant 0 : i32
    %c0_i32_0 = arith.constant 0 : i32
    %c0_i32_1 = arith.constant 0 : i32
    return %c0_i32, %c0_i32_0 : i32, i32
  }
  func.func @transform_10(%arg0: i32) -> (i32, i32) {
    %c0_i32 = arith.constant 0 : i32
    %c0_i32_0 = arith.constant 0 : i32
    %c0_i32_1 = arith.constant 0 : i32
    return %c0_i32, %c0_i32_0 : i32, i32
  }
  func.func @transform_11(%arg0: i32) -> (i32, i32) {
    %c0_i32 = arith.constant 0 : i32
    %c0_i32_0 = arith.constant 0 : i32
    return %arg0, %c0_i32 : i32, i32
  }
}

</mosaic_0001>

<bundles_post_ra>
// kernel: tpu_custom_call.1
= control target key start
LH: loop header
LB: loop body
LE: loop exit
PB: predicated region body
PF: predicated region fallthrough
CT: control target
= control target key end

     0   :  { %16 = vsyncpa [#allocation3], 0  ;;  %s933_s0 = inlined_call_operand.vmem [shape: f32[8,22], index: 0, kind: input, shape index: {}]   ;;  %s934_s1 = inlined_call_operand.vmem [shape: f32[1,22], index: 1, kind: input, shape index: {}]   ;;  %s935_s2 = inlined_call_operand.vmem [shape: f32[1,22], index: 2, kind: input, shape index: {}]   ;;  %s936_s3 = inlined_call_operand.hbm [shape: f32[22,96], index: 3, kind: input, shape index: {}]   ;;  %s937_s4 = inlined_call_operand.vmem [shape: f32[1,96], index: 4, kind: input, shape index: {}]   ;;  %s938_s5 = inlined_call_operand.vmem [shape: f32[96,96], index: 5, kind: input, shape index: {}]   ;;  %s939_s6 = inlined_call_operand.vmem [shape: f32[1,96], index: 6, kind: input, shape index: {}]   ;;  %s940_s7 = inlined_call_operand.hbm [shape: f32[96,96], index: 7, kind: input, shape index: {}]   ;;  %s941_s8 = inlined_call_operand.vmem [shape: f32[1,96], index: 8, kind: input, shape index: {}]   ;;  %s942_s9 = inlined_call_operand.vmem [shape: f32[96,3], index: 9, kind: input, shape index: {}]   ;;  %s943_s10 = inlined_call_operand.vmem [shape: f32[1,3], index: 10, kind: input, shape index: {}]   ;;  %s944_s11 = inlined_call_operand.vmem [shape: f32[8,3], index: 11, kind: output, shape index: {}]  }
   0x1   :  { %17 = vsyncpa [#allocation5], 0  ;;  %s715_s17 = smov [#allocation2]   ;;  %s667_s21 = scalar_lea.hbm %s936_s3, 384 }
   0x2   :  { %s29_s18 = sshll.u32 %s715_s17, 4  ;;  %p668_p0 = scmp.ne.s32.totalorder %s936_s3, %s667_s21  ;;  %s30_s18 = int_to_ptr.vmem [resolvable:$true] %s29_s18 }
   0x3   :  { %p671_p1 = scmp.lt.u32.totalorder %s667_s21, %s936_s3 }
   0x5   :  { %p673_p2 = pnand %p671_p1, %p668_p0 }
   0x7   :  { %676 = shalt.err (!%p673_p2)
}
   0x8   :  { %s677_s26 = scalar_lea.vmem %s30_s18, 384  ;;  %p682_p4 = scmp.lt.s32.totalorder %s30_s18, %s30_s18 }
   0x9   :  { %p678_p3 = scmp.ne.s32.totalorder %s30_s18, %s677_s26  ;;  %p683_p5 = scmp.lt.s32.totalorder %s677_s26, %s677_s26 }
   0xb   :  { %p684_p6 = por %p683_p5, %p682_p4 }
   0xd   :  { %p685_p7 = pnand %p684_p6, %p678_p3 }
   0xf   :  { %688 = shalt.err (!%p685_p7)
}
  0x10   :  { %s716_s27 = smov 128   ;;  %s717_s28 = smov 8  }
  0x11   :  { %35 = dma.hbm_to_vmem [thread:$0]  %s936_s3, 384, %s30_s18, [#allocation3], %s716_s27, %s716_s27, %s717_s28  }
  0x12   :  { %s718_s12 = smov [#allocation4]   ;;  %s689_s16 = scalar_lea.hbm %s940_s7, 1536 }
  0x13   :  { %s47_s13 = sshll.u32 %s718_s12, 4  ;;  %p690_p8 = scmp.ne.s32.totalorder %s940_s7, %s689_s16  ;;  %s48_s13 = int_to_ptr.vmem [resolvable:$true] %s47_s13 }
  0x14   :  { %p693_p9 = scmp.lt.u32.totalorder %s689_s16, %s940_s7 }
  0x16   :  { %p695_p10 = pnand %p693_p9, %p690_p8 }
  0x18   :  { %698 = shalt.err (!%p695_p10)
}
  0x19   :  { %s699_s22 = scalar_lea.vmem %s48_s13, 1536  ;;  %p704_p12 = scmp.lt.s32.totalorder %s48_s13, %s48_s13 }
  0x1a   :  { %p700_p11 = scmp.ne.s32.totalorder %s48_s13, %s699_s22  ;;  %p705_p13 = scmp.lt.s32.totalorder %s699_s22, %s699_s22 }
  0x1c   :  { %p706_p0 = por %p705_p13, %p704_p12 }
  0x1e   :  { %p707_p1 = pnand %p706_p0, %p700_p11 }
  0x20   :  { %710 = shalt.err (!%p707_p1)
}
  0x21   :  { %53 = dma.hbm_to_vmem [thread:$0]  %s940_s7, 1536, %s48_s13, [#allocation5], %s716_s27, %s716_s27, %s717_s28  }
  0x22   :  { %711 = dma.done.wait [#allocation3], 384  }
  0x23   :  { %712 = vsyncadd [#allocation3], 4294966912 }
  0x24   :  { %713 = dma.done.wait [#allocation5], 1536  }
  0x25   :  { %714 = vsyncadd [#allocation5], 4294965760  ;;  %v719_v0 = vmov 0.0|0.0   ;;  %vm720_vm0 = vmmov 0   ;;  %v721_v1 = vmov 0.0   ;;  %v83_v2 = vld [vmem:[#allocation2] sm:$0xff] }
  0x26   :  { %603 = vmatprep.subr.bf16.mxu0 %v719_v0  ;;  %519 = vmatprep.mubr.msk.f32.mxu0 %vm720_vm0, %v721_v1  ;;  %v84_v3 = vld [vmem:[#allocation2 + $0x8] sm:$0xff]  ;;  %v66_v5 = vld [vmem:[%s933_s0] sm:$0xff]  ;;  %v174_v11 = vld [vmem:[%s938_s5 + $0x10] sm:$0xff]  ;;  %vm97_vm1 = vcmask 1045504   ;;  %vm93_vm2 = vcmask 179200   ;;  %vm191_vm3 = vcmask 785408  }
  0x27   :  { %606 = vmatprep.subr.bf16.mxu1 %v719_v0  ;;  %546 = vmatprep.mubr.msk.f32.mxu1 %vm720_vm0, %v721_v1  ;;  %v604_v4 = vpack.c.bf16 %v84_v3, %v83_v2  ;;  %v459_v6 = vld [vmem:[%s934_s1] ss:$0 sm:$0xff]  ;;  %v173_v10 = vld [vmem:[%s938_s5 + $0x8] sm:$0xff]  ;;  %v175_v13 = vld [vmem:[%s938_s5 + $0x18] sm:$0xff]  ;;  %vm451_vm4 = vcmask 23552  }
  0x28   :  { %v460_v7 = vld [vmem:[%s935_s2] ss:$0 sm:$0xff]  ;;  %v74_v8 = vmul.f32 %v459_v6, %v66_v5  ;;  %v85_v14 = vld [vmem:[#allocation2 + $0x10] sm:$0x3f]  ;;  %v610_v16 = vpack.c.bf16 %v175_v13, %v174_v11  ;;  %v177_v18 = vld [vmem:[%s938_s5 + $0x28] sm:$0xff] }
  0x29   :  { %v172_v9 = vld [vmem:[%s938_s5] sm:$0xff]  ;;  %605 = vmatpush3.bf16.msra.mxu0 %v604_v4  ;;  %v178_v20 = vld [vmem:[%s938_s5 + $0x30] sm:$0xff]  ;;  %v179_v21 = vld [vmem:[%s938_s5 + $0x38] sm:$0xff] }
  0x2a   :  { %v607_v12 = vpack.c.bf16 %v173_v10, %v172_v9  ;;  %517 = vmatprep.subr.mxu0 %v721_v1  ;;  %v82_v15 = vadd.f32 %v460_v7, %v74_v8  ;;  %v176_v17 = vld [vmem:[%s938_s5 + $0x20] sm:$0xff]  ;;  %v616_v22 = vpack.c.bf16 %v179_v21, %v178_v20  ;;  %v181_v24 = vld [vmem:[%s938_s5 + $0x48] sm:$0xff]  ;;  %v182_v26 = vld [vmem:[%s938_s5 + $0x50] sm:$0xff] }
  0x2b   :  { %v613_v19 = vpack.c.bf16 %v177_v18, %v176_v17  ;;  %v180_v23 = vld [vmem:[%s938_s5 + $0x40] sm:$0xff]  ;;  %v183_v27 = vld [vmem:[%s938_s5 + $0x58] sm:$0xff]  ;;  %v268_v31 = vld [vmem:[#allocation4 + $0x10] sm:$0xff] }
  0x2c   :  { %608 = vmatpush3.bf16.msra.mxu1 %v607_v12  ;;  %v619_v25 = vpack.c.bf16 %v181_v24, %v180_v23  ;;  %v622_v28 = vpack.c.bf16 %v183_v27, %v182_v26  ;;  %v266_v29 = vld [vmem:[#allocation4] sm:$0xff]  ;;  %v267_v30 = vld [vmem:[#allocation4 + $0x8] sm:$0xff]  ;;  %v269_v33 = vld [vmem:[#allocation4 + $0x18] sm:$0xff] }
  0x2d   :  { %609 = vmatprep.subr.bf16.mxu1 %v719_v0  ;;  %518 = vmatpush3.msk.msra.mxu0 %vm97_vm1, %v85_v14  ;;  %v625_v32 = vpack.c.bf16 %v267_v30, %v266_v29  ;;  %v628_v34 = vpack.c.bf16 %v269_v33, %v268_v31  ;;  %v270_v35 = vld [vmem:[#allocation4 + $0x20] sm:$0xff]  ;;  %v271_v36 = vld [vmem:[#allocation4 + $0x28] sm:$0xff]  ;;  %v272_v38 = vld [vmem:[#allocation4 + $0x30] sm:$0xff] }
  0x2e   :  { %520 = vmatmul.mubr.msk.f32.vlgmr.msra.gmra.mrb[0].mxu0 %vm93_vm2, %v82_v15  ;;  %624 = vmatprep.subr.bf16.mxu0 %v719_v0  ;;  %v631_v37 = vpack.c.bf16 %v271_v36, %v270_v35  ;;  %v273_v39 = vld [vmem:[#allocation4 + $0x38] sm:$0xff]  ;;  %v274_v41 = vld [vmem:[#allocation4 + $0x40] sm:$0xff]  ;;  %v275_v42 = vld [vmem:[#allocation4 + $0x48] sm:$0xff] }
  0x2f   :  { %573 = vmatprep.mubr.msk.f32.mxu0 %vm720_vm0, %v721_v1  ;;  %626 = vmatpush3.bf16.msra.mxu0 %v625_v32  ;;  %v634_v40 = vpack.c.bf16 %v273_v39, %v272_v38  ;;  %v637_v43 = vpack.c.bf16 %v275_v42, %v274_v41  ;;  %v461_v44 = vld [vmem:[%s937_s4] ss:$0 sm:$0xff]  ;;  %v276_v49 = vld [vmem:[#allocation4 + $0x50] sm:$0xff]  ;;  %v277_v50 = vld [vmem:[#allocation4 + $0x58] sm:$0xff] }
  0x30   :  { %611 = vmatpush3.bf16.msra.mxu1 %v610_v16  ;;  %627 = vmatprep.subr.bf16.mxu0 %v719_v0  ;;  %v640_v51 = vpack.c.bf16 %v277_v50, %v276_v49  ;;  %v359_v52 = vld [vmem:[%s942_s9] sm:$0xff]  ;;  %v360_v53 = vld [vmem:[%s942_s9 + $0x8] sm:$0xff]  ;;  %v361_v54 = vld [vmem:[%s942_s9 + $0x10] sm:$0xff] }
  0x31   :  { %612 = vmatprep.subr.bf16.mxu1 %v719_v0  ;;  %v643_v55 = vpack.c.bf16 %v360_v53, %v359_v52  ;;  %v362_v56 = vld [vmem:[%s942_s9 + $0x18] sm:$0xff]  ;;  %v363_v58 = vld [vmem:[%s942_s9 + $0x20] sm:$0xff]  ;;  %v364_v59 = vld [vmem:[%s942_s9 + $0x28] sm:$0xff] }
  0x32   :  { %v646_v57 = vpack.c.bf16 %v362_v56, %v361_v54  ;;  %v649_v60 = vpack.c.bf16 %v364_v59, %v363_v58  ;;  %v365_v61 = vld [vmem:[%s942_s9 + $0x30] sm:$0xff]  ;;  %v366_v62 = vld [vmem:[%s942_s9 + $0x38] sm:$0xff]  ;;  %v368_v2 = vld [vmem:[%s942_s9 + $0x48] sm:$0xff] }
  0x33   :  { %629 = vmatpush3.bf16.msra.mxu0 %v628_v34  ;;  %v652_v63 = vpack.c.bf16 %v366_v62, %v365_v61  ;;  %v464_v4 = vld [vmem:[%s939_s6] ss:$0 sm:$0xff]  ;;  %v369_v9 = vld [vmem:[%s942_s9 + $0x50] sm:$0xff]  ;;  %v370_v10 = vld [vmem:[%s942_s9 + $0x58] sm:$0xff] }
  0x34   :  { %614 = vmatpush3.bf16.msra.mxu1 %v613_v19  ;;  %630 = vmatprep.subr.bf16.mxu0 %v719_v0  ;;  %v658_v11 = vpack.c.bf16 %v370_v10, %v369_v9  ;;  %v468_v16 = vld [vmem:[%s943_s10] ss:$0 sm:$0xff] }
  0x35   :  { %615 = vmatprep.subr.bf16.mxu1 %v719_v0 }
  0x37   :  { %632 = vmatpush3.bf16.msra.mxu0 %v631_v37 }
  0x38   :  { %617 = vmatpush3.bf16.msra.mxu1 %v616_v22  ;;  %633 = vmatprep.subr.bf16.mxu0 %v719_v0 }
  0x39   :  { %618 = vmatprep.subr.bf16.mxu1 %v719_v0 }
  0x3b   :  { %635 = vmatpush3.bf16.msra.mxu0 %v634_v40 }
  0x3c   :  { %620 = vmatpush3.bf16.msra.mxu1 %v619_v25  ;;  %636 = vmatprep.subr.bf16.mxu0 %v719_v0 }
  0x3d   :  { %621 = vmatprep.subr.bf16.mxu1 %v719_v0 }
  0x3f   :  { %638 = vmatpush3.bf16.msra.mxu0 %v637_v43 }
  0x40   :  { %623 = vmatpush3.bf16.msra.mxu1 %v622_v28  ;;  %639 = vmatprep.subr.bf16.mxu0 %v719_v0 }
  0x41   :  { %642 = vmatprep.subr.bf16.mxu1 %v719_v0 }
  0x43   :  { %641 = vmatpush3.bf16.msra.mxu0 %v640_v51 }
 0x101   :  { %v167_v45 = vpop.f32.mrb[0].mxu0 }
 0x102   :  { %v168_v46 = vadd.f32 %v461_v44, %v167_v45  ;;  %v521_v47 = vpop.f32.mrb[1].mxu0 }
 0x104   :  { %v171_v48 = vmax.f32 %v168_v46, 0.0 }
 0x106   :  { %547 = vmatmul.mubr.msk.f32.vlgmr.msra.gmra.mrb[0].mxu1 %vm191_vm3, %v171_v48 }
 0x107   :  { %600 = vmatprep.mubr.msk.f32.mxu1 %vm720_vm0, %v721_v1  ;;  %644 = vmatpush3.bf16.msra.mxu1 %v643_v55  ;;  %v367_v1 = vld [vmem:[%s942_s9 + $0x40] sm:$0xff] }
 0x108   :  { %645 = vmatprep.subr.bf16.mxu1 %v719_v0  ;;  %v655_v3 = vpack.c.bf16 %v368_v2, %v367_v1 }
 0x10b   :  { %647 = vmatpush3.bf16.msra.mxu1 %v646_v57 }
 0x10c   :  { %648 = vmatprep.subr.bf16.mxu1 %v719_v0 }
 0x10f   :  { %650 = vmatpush3.bf16.msra.mxu1 %v649_v60 }
 0x110   :  { %651 = vmatprep.subr.bf16.mxu1 %v719_v0 }
 0x113   :  { %653 = vmatpush3.bf16.msra.mxu1 %v652_v63 }
 0x114   :  { %654 = vmatprep.subr.bf16.mxu1 %v719_v0 }
 0x117   :  { %656 = vmatpush3.bf16.msra.mxu1 %v655_v3 }
 0x118   :  { %657 = vmatprep.subr.bf16.mxu1 %v719_v0  ;;  %v466_v0 = vld [vmem:[%s941_s8] ss:$0 sm:$0xff] }
 0x11b   :  { %659 = vmatpush3.bf16.msra.mxu1 %v658_v11 }
 0x1d9   :  { %v261_v5 = vpop.f32.mrb[0].mxu1 }
 0x1da   :  { %v262_v6 = vadd.f32 %v464_v4, %v261_v5  ;;  %v548_v7 = vpop.f32.mrb[1].mxu1 }
 0x1dc   :  { %v265_v8 = vmax.f32 %v262_v6, 0.0 }
 0x1de   :  { %574 = vmatmul.mubr.msk.f32.vlgmr.msra.gmra.mrb[2].mxu0 %vm191_vm3, %v265_v8 }
 0x2b1   :  { %v354_v12 = vpop.f32.mrb[2].mxu0 }
 0x2b2   :  { %v355_v13 = vadd.f32 %v466_v0, %v354_v12  ;;  %v575_v14 = vpop.f32.mrb[3].mxu0 }
 0x2b4   :  { %v358_v15 = vmax.f32 %v355_v13, 0.0 }
 0x2b6   :  { %601 = vmatmul.mubr.msk.f32.vlgmr.msra.gmra.mrb[2].mxu1 %vm191_vm3, %v358_v15 }
 0x389   :  { %v447_v17 = vpop.f32.mrb[2].mxu1 }
 0x38a   :  { %v448_v18 = vadd.f32 %v468_v16, %v447_v17  ;;  %v602_v19 = vpop.f32.mrb[3].mxu1 }
 0x38c   :  { %452 = vst.msk [vmem:[%s944_s11] sm:$0xff] %vm451_vm4, %v448_v18 }
 0x38d   :  { %457 = vsyncpa [#allocation3], 1 }
 0x38e   :  { %458 = vsyncpa [#allocation5], 1 }

</bundles_post_ra>
